<compile_context>
chip_gen: v7x
topology: tpu7x:2x2x1
jax: 0.10.0
libtpu: 0.0.40
codegen_flags: <defaults>
</compile_context>

<pallas_src>
import functools

import jax
import jax.numpy as jnp
from jax import lax
from jax.experimental import pallas as pl
from jax.experimental.pallas import tpu as pltpu

INPUT_SIZE = 20
H1 = 64
H2 = 32
OUT = 4

LANE = 128  # lane width; batch tiles are multiples of this


def _round_up(v, m):
    return ((v + m - 1) // m) * m


def mlp_kernel(x_ref, w1_ref, b1_ref, w2_ref, b2_ref, w3_ref, b3_ref, oT_ref):
    # x_ref: [tb, INPUT_SIZE] (untransposed batch tile, straight from HBM).
    x = x_ref[...].astype(jnp.bfloat16)

    # fc1 + relu.  Contract the feature dims of w1 [H1, IN] and x [tb, IN]
    # ("A @ B^T" form) so the result is batch-on-lanes [H1, tb] with no wrapper
    # transpose.  bf16 operands, f32 accumulation (single MXU pass).
    h = lax.dot_general(
        w1_ref[...].astype(jnp.bfloat16), x,
        (((1,), (1,)), ((), ())), preferred_element_type=jnp.float32)
    h = jnp.maximum(h + b1_ref[...], 0.0)                      # [H1, tb] f32

    # fc2 + relu (dropout is a no-op at inference).
    h = lax.dot_general(
        w2_ref[...].astype(jnp.bfloat16), h.astype(jnp.bfloat16),
        (((1,), (0,)), ((), ())), preferred_element_type=jnp.float32)
    h = jnp.maximum(h + b2_ref[...], 0.0)                      # [H2, tb] f32

    # fc3 (logits) -- lane-dense [OUT, tb] store.
    logits = lax.dot_general(
        w3_ref[...].astype(jnp.bfloat16), h.astype(jnp.bfloat16),
        (((1,), (0,)), ((), ())), preferred_element_type=jnp.float32)
    oT_ref[...] = (logits + b3_ref[...]).astype(oT_ref.dtype)  # [OUT, tb]


@functools.partial(jax.jit, static_argnames=("batch_tile", "batch_major_output"))
def spoof_classifier_forward(x, params, *, batch_tile=8192, batch_major_output=True):
    """x: [B, INPUT_SIZE] f32; params in PyTorch layout (W: [out, in], b: [out, 1]).

    batch_tile: steady-state batch tile (lane axis of the in-kernel activations).
      8192 is a good default everywhere; 16k-32k is fine too (raise vmem_limit_bytes
      if you push past ~16k on v5e).  The tile is additionally capped at ~B/2 so the
      grid has >= 2 steps when possible (lets v7x shard the batch over both cores).
    batch_major_output: True -> return [B, 4] (module layout, one tiny XLA transpose);
      False -> return the kernel's native lane-dense [4, B] logits.
    """
    w1, b1, w2, b2, w3, b3 = params
    B = x.shape[0]

    # Lane-aligned tile; aim for >= 2 grid steps whenever B allows.
    tb = max(LANE, min(batch_tile, _round_up(pl.cdiv(B, 2), LANE)))
    grid = (pl.cdiv(B, tb),)  # ragged last tile handled by Pallas edge masking

    const = lambda i: (0, 0)  # weights/biases: constant block index -> VMEM-resident

    oT = pl.pallas_call(
        mlp_kernel,
        out_shape=jax.ShapeDtypeStruct((OUT, B), jnp.float32),
        grid_spec=pltpu.PrefetchScalarGridSpec(
            num_scalar_prefetch=0,
            grid=grid,
            in_specs=[
                pl.BlockSpec((tb, INPUT_SIZE), lambda i: (i, 0)),  # x tile (pipelined)
                pl.BlockSpec((H1, INPUT_SIZE), const),             # w1  [64, 20]
                pl.BlockSpec((H1, 1), const),                      # b1  [64, 1]
                pl.BlockSpec((H2, H1), const),                     # w2  [32, 64]
                pl.BlockSpec((H2, 1), const),                      # b2  [32, 1]
                pl.BlockSpec((OUT, H2), const),                    # w3  [4, 32]
                pl.BlockSpec((OUT, 1), const),                     # b3  [4, 1]
            ],
            out_specs=pl.BlockSpec((OUT, tb), lambda i: (0, i)),
        ),
        compiler_params=pltpu.CompilerParams(
            dimension_semantics=("parallel",),   # megacore sharding on v7x
            # The (tb, 20) input blocks pad to 128 lanes in VMEM; give headroom over
            # v5e's 16 MiB scoped default.  48 MiB < physical VMEM on all generations.
            vmem_limit_bytes=48 * 1024 * 1024,
        ),
    )(x, w1, b1, w2, b2, w3, b3)

    if batch_major_output:
        return oT.T          # [B, OUT] (module layout)
    return oT                # [OUT, B] (lane-dense, no extra pass)


def init_params(key):
    """Deterministic init mimicking PyTorch Linear default (uniform +/- 1/sqrt(fan_in)).

    Stored in PyTorch layout: W [out, in], b [out, 1].
    """
    ks = jax.random.split(key, 6)

    def linear(kw, kb, fan_in, fan_out):
        bound = 1.0 / jnp.sqrt(fan_in)
        w = jax.random.uniform(kw, (fan_out, fan_in), jnp.float32, -bound, bound)
        b = jax.random.uniform(kb, (fan_out, 1), jnp.float32, -bound, bound)
        return w, b

    w1, b1 = linear(ks[0], ks[1], INPUT_SIZE, H1)
    w2, b2 = linear(ks[2], ks[3], H1, H2)
    w3, b3 = linear(ks[4], ks[5], H2, OUT)
    return (w1, b1, w2, b2, w3, b3)


def _reference_f32(x, params):
    w1, b1, w2, b2, w3, b3 = params
    h = jnp.maximum(x @ w1.T + b1[:, 0], 0.0)
    h = jnp.maximum(h @ w2.T + b2[:, 0], 0.0)
    return h @ w3.T + b3[:, 0]


def _reference_bf16(x, params):
    """Same math path as the kernel (bf16 operands, f32 accumulation)."""
    w1, b1, w2, b2, w3, b3 = params

    def f(a, b):
        return lax.dot_general(a.astype(jnp.bfloat16), b.astype(jnp.bfloat16),
                               (((1,), (1,)), ((), ())),
                               preferred_element_type=jnp.float32)

    h = jnp.maximum(f(x, w1) + b1[:, 0], 0.0)
    h = jnp.maximum(f(h, w2) + b2[:, 0], 0.0)
    return f(h, w3) + b3[:, 0]


if __name__ == "__main__":
    key = jax.random.PRNGKey(0)
    kx, kp = jax.random.split(key)
    params = init_params(kp)

    # Small-shape check (single tile, ragged: B < tile).
    B = 8
    x = jax.random.normal(kx, (B, INPUT_SIZE), jnp.float32)
    out = spoof_classifier_forward(x, params)
    jax.block_until_ready(out)
    assert out.shape == (B, OUT)
    assert jnp.allclose(out, _reference_bf16(x, params), atol=2e-3, rtol=2e-3)
    assert jnp.allclose(out, _reference_f32(x, params), atol=3e-2, rtol=3e-2)

    # Multi-step grid with default tile sizing (2 steps, ragged last tile).
    B2 = 300
    x2 = jax.random.normal(jax.random.PRNGKey(1), (B2, INPUT_SIZE), jnp.float32)
    out2 = spoof_classifier_forward(x2, params)
    jax.block_until_ready(out2)
    assert out2.shape == (B2, OUT)
    assert jnp.allclose(out2, _reference_bf16(x2, params), atol=2e-3, rtol=2e-3)

    # Explicit small tile -> 3-step ragged grid, plus class-major output path.
    out3 = spoof_classifier_forward(x2, params, batch_tile=128,
                                    batch_major_output=False)
    jax.block_until_ready(out3)
    assert out3.shape == (OUT, B2)
    assert jnp.allclose(out3.T, _reference_bf16(x2, params), atol=2e-3, rtol=2e-3)

    print("KERNEL_OK")
</pallas_src>

<mosaic_0001>
module attributes {stable_mosaic.version = 11 : i64} {
  func.func @mlp_kernel(%arg0: i32, %arg1: memref<128x20xf32, #tpu.memory_space<vmem>>, %arg2: memref<64x20xf32, #tpu.memory_space<vmem>>, %arg3: memref<64x1xf32, #tpu.memory_space<vmem>>, %arg4: memref<32x64xf32, #tpu.memory_space<vmem>>, %arg5: memref<32x1xf32, #tpu.memory_space<vmem>>, %arg6: memref<4x32xf32, #tpu.memory_space<vmem>>, %arg7: memref<4x1xf32, #tpu.memory_space<vmem>>, %arg8: memref<4x128xf32, #tpu.memory_space<vmem>>) attributes {dimension_semantics = [#tpu.dimension_semantics<parallel>], iteration_bounds = array<i64: 1>, scalar_prefetch = 0 : i64, scratch_operands = 0 : i64, tpu.core_type = #tpu.core_type<tc>, window_params = [{transform_indices = @transform_0, window_bounds = array<i64: 128, 20>}, {pipeline_mode = #tpu.pipeline_mode<synchronous>, transform_indices = @transform_1, window_bounds = array<i64: 64, 20>}, {pipeline_mode = #tpu.pipeline_mode<synchronous>, transform_indices = @transform_2, window_bounds = array<i64: 64, 1>}, {pipeline_mode = #tpu.pipeline_mode<synchronous>, transform_indices = @transform_3, window_bounds = array<i64: 32, 64>}, {pipeline_mode = #tpu.pipeline_mode<synchronous>, transform_indices = @transform_4, window_bounds = array<i64: 32, 1>}, {pipeline_mode = #tpu.pipeline_mode<synchronous>, transform_indices = @transform_5, window_bounds = array<i64: 4, 32>}, {pipeline_mode = #tpu.pipeline_mode<synchronous>, transform_indices = @transform_6, window_bounds = array<i64: 4, 1>}, {transform_indices = @transform_7, window_bounds = array<i64: 4, 128>}]} {
    %c0 = arith.constant 0 : index
    %c0_0 = arith.constant 0 : index
    %0 = vector.load %arg1[%c0, %c0_0] : memref<128x20xf32, #tpu.memory_space<vmem>>, vector<128x20xf32>
    %1 = arith.truncf %0 : vector<128x20xf32> to vector<128x20xbf16>
    %c0_1 = arith.constant 0 : index
    %c0_2 = arith.constant 0 : index
    %2 = vector.load %arg2[%c0_1, %c0_2] : memref<64x20xf32, #tpu.memory_space<vmem>>, vector<64x20xf32>
    %3 = arith.truncf %2 : vector<64x20xf32> to vector<64x20xbf16>
    %cst = arith.constant dense<0.000000e+00> : vector<64x128xf32>
    %4 = tpu.matmul %3, %1, %cst {dimension_numbers = #tpu.dot_dimension_numbers<[1], [1], [0], [0], [0, 0, 1, 0], [], []>} : vector<64x20xbf16>, vector<128x20xbf16>, vector<64x128xf32> -> vector<64x128xf32>
    %c0_3 = arith.constant 0 : index
    %c0_4 = arith.constant 0 : index
    %5 = vector.load %arg3[%c0_3, %c0_4] : memref<64x1xf32, #tpu.memory_space<vmem>>, vector<64x1xf32>
    %6 = vector.broadcast %5 : vector<64x1xf32> to vector<64x128xf32>
    %7 = arith.addf %4, %6 : vector<64x128xf32>
    %cst_5 = arith.constant 0.000000e+00 : f32
    %8 = vector.broadcast %cst_5 : f32 to vector<64x128xf32>
    %9 = arith.maximumf %7, %8 : vector<64x128xf32>
    %c0_6 = arith.constant 0 : index
    %c0_7 = arith.constant 0 : index
    %10 = vector.load %arg4[%c0_6, %c0_7] : memref<32x64xf32, #tpu.memory_space<vmem>>, vector<32x64xf32>
    %11 = arith.truncf %10 : vector<32x64xf32> to vector<32x64xbf16>
    %12 = arith.truncf %9 : vector<64x128xf32> to vector<64x128xbf16>
    %cst_8 = arith.constant dense<0.000000e+00> : vector<32x128xf32>
    %13 = tpu.matmul %11, %12, %cst_8 {dimension_numbers = #tpu.dot_dimension_numbers<[1], [0], [0], [1], [0, 0, 1, 1], [], []>} : vector<32x64xbf16>, vector<64x128xbf16>, vector<32x128xf32> -> vector<32x128xf32>
    %c0_9 = arith.constant 0 : index
    %c0_10 = arith.constant 0 : index
    %14 = vector.load %arg5[%c0_9, %c0_10] : memref<32x1xf32, #tpu.memory_space<vmem>>, vector<32x1xf32>
    %15 = vector.broadcast %14 : vector<32x1xf32> to vector<32x128xf32>
    %16 = arith.addf %13, %15 : vector<32x128xf32>
    %cst_11 = arith.constant 0.000000e+00 : f32
    %17 = vector.broadcast %cst_11 : f32 to vector<32x128xf32>
    %18 = arith.maximumf %16, %17 : vector<32x128xf32>
    %c0_12 = arith.constant 0 : index
    %c0_13 = arith.constant 0 : index
    %19 = vector.load %arg6[%c0_12, %c0_13] : memref<4x32xf32, #tpu.memory_space<vmem>>, vector<4x32xf32>
    %20 = arith.truncf %19 : vector<4x32xf32> to vector<4x32xbf16>
    %21 = arith.truncf %18 : vector<32x128xf32> to vector<32x128xbf16>
    %cst_14 = arith.constant dense<0.000000e+00> : vector<4x128xf32>
    %22 = tpu.matmul %20, %21, %cst_14 {dimension_numbers = #tpu.dot_dimension_numbers<[1], [0], [0], [1], [0, 0, 1, 1], [], []>} : vector<4x32xbf16>, vector<32x128xbf16>, vector<4x128xf32> -> vector<4x128xf32>
    %c0_15 = arith.constant 0 : index
    %c0_16 = arith.constant 0 : index
    %23 = vector.load %arg7[%c0_15, %c0_16] : memref<4x1xf32, #tpu.memory_space<vmem>>, vector<4x1xf32>
    %24 = vector.broadcast %23 : vector<4x1xf32> to vector<4x128xf32>
    %25 = arith.addf %22, %24 : vector<4x128xf32>
    %c0_17 = arith.constant 0 : index
    %c0_18 = arith.constant 0 : index
    %26 = vector.load %arg8[%c0_17, %c0_18] : memref<4x128xf32, #tpu.memory_space<vmem>>, vector<4x128xf32>
    tpu.vector_store %arg8[%c0_17, %c0_18], %25 {strides = array<i32>} : memref<4x128xf32, #tpu.memory_space<vmem>>, vector<4x128xf32>,
    return
  }
  func.func @transform_0(%arg0: i32) -> (i32, i32) {
    %c0_i32 = arith.constant 0 : i32
    %c0_i32_0 = arith.constant 0 : i32
    return %arg0, %c0_i32 : i32, i32
  }
  func.func @transform_1(%arg0: i32) -> (i32, i32) {
    %c0_i32 = arith.constant 0 : i32
    %c0_i32_0 = arith.constant 0 : i32
    %c0_i32_1 = arith.constant 0 : i32
    return %c0_i32, %c0_i32_0 : i32, i32
  }
  func.func @transform_2(%arg0: i32) -> (i32, i32) {
    %c0_i32 = arith.constant 0 : i32
    %c0_i32_0 = arith.constant 0 : i32
    %c0_i32_1 = arith.constant 0 : i32
    return %c0_i32, %c0_i32_0 : i32, i32
  }
  func.func @transform_3(%arg0: i32) -> (i32, i32) {
    %c0_i32 = arith.constant 0 : i32
    %c0_i32_0 = arith.constant 0 : i32
    %c0_i32_1 = arith.constant 0 : i32
    return %c0_i32, %c0_i32_0 : i32, i32
  }
  func.func @transform_4(%arg0: i32) -> (i32, i32) {
    %c0_i32 = arith.constant 0 : i32
    %c0_i32_0 = arith.constant 0 : i32
    %c0_i32_1 = arith.constant 0 : i32
    return %c0_i32, %c0_i32_0 : i32, i32
  }
  func.func @transform_5(%arg0: i32) -> (i32, i32) {
    %c0_i32 = arith.constant 0 : i32
    %c0_i32_0 = arith.constant 0 : i32
    %c0_i32_1 = arith.constant 0 : i32
    return %c0_i32, %c0_i32_0 : i32, i32
  }
  func.func @transform_6(%arg0: i32) -> (i32, i32) {
    %c0_i32 = arith.constant 0 : i32
    %c0_i32_0 = arith.constant 0 : i32
    %c0_i32_1 = arith.constant 0 : i32
    return %c0_i32, %c0_i32_0 : i32, i32
  }
  func.func @transform_7(%arg0: i32) -> (i32, i32) {
    %c0_i32 = arith.constant 0 : i32
    %c0_i32_0 = arith.constant 0 : i32
    return %c0_i32, %arg0 : i32, i32
  }
}

</mosaic_0001>

<bundles_post_ra>
// kernel: spoof_classifier_forward.1
= control target key start
LH: loop header
LB: loop body
LE: loop exit
PB: predicated region body
PF: predicated region fallthrough
CT: control target
= control target key end

     0   :  { %vm112_vm0 = vcmask 162816   ;;  %v495_v5 = vmov 0   ;;  %s699_s0 = inlined_call_operand.vmem [shape: f32[8,20], index: 0, kind: input, shape index: {}]   ;;  %s700_s1 = inlined_call_operand.vmem [shape: f32[64,20], index: 1, kind: input, shape index: {}]   ;;  %s701_s2 = inlined_call_operand.vmem [shape: f32[64,1], index: 2, kind: input, shape index: {}]   ;;  %s702_s3 = inlined_call_operand.vmem [shape: f32[32,64], index: 3, kind: input, shape index: {}]   ;;  %s703_s4 = inlined_call_operand.vmem [shape: f32[32,1], index: 4, kind: input, shape index: {}]   ;;  %s704_s5 = inlined_call_operand.vmem [shape: f32[4,32], index: 5, kind: input, shape index: {}]   ;;  %s705_s6 = inlined_call_operand.vmem [shape: f32[4,1], index: 6, kind: input, shape index: {}]   ;;  %s706_s7 = inlined_call_operand.hbm [shape: f32[4,8], index: 7, kind: output, shape index: {}]  }
   0x1   :  { %v28_v0 = vld [vmem:[%s699_s0] sm:$0xff]  ;;  %v29_v1 = vld [vmem:[%s699_s0 + $0x8] sm:$0xff]  ;;  %v30_v2 = vld [vmem:[%s699_s0 + $0x10] sm:$0xff]  ;;  %469 = vset.pattern.permute.xlu0 %v495_v5  ;;  %470 = vset.pattern.permute.xlu1 %v495_v5 }
   0x2   :  { %v44_v3 = vpack.c.bf16 %v29_v1, %v28_v0  ;;  %v31_v4 = vld [vmem:[%s699_s0 + $0x18] sm:$0xff]  ;;  %v52_v8 = vld [vmem:[%s700_s1] sm:$0xff]  ;;  %v53_v9 = vld [vmem:[%s700_s1 + $0x8] sm:$0xff] }
   0x3   :  { %v45_v6 = vpack.c.bf16 %v31_v4, %v30_v2  ;;  %v32_v10 = vld [vmem:[%s699_s0 + $0x20] sm:$0xff]  ;;  %v33_v11 = vld [vmem:[%s699_s0 + $0x28] sm:$0xff]  ;;  %v60_v12 = vpack.c.bf16 %v53_v9, %v52_v8  ;;  %v66_v14 = vld [vmem:[%s701_s2 + $0x10] sm:$0xff] }
   0x4   :  { %457 = vmatprep.subr.msk.bf16.mxu0 %vm112_vm0, %v44_v3  ;;  %v126_v7 = vsel %vm112_vm0, %v44_v3, 0  ;;  %v64_v13 = vld [vmem:[%s701_s2] sm:$0xff]  ;;  %v46_v16 = vpack.c.bf16 %v33_v11, %v32_v10  ;;  %84 = vperm.xlu1 %470, %v66_v14   ;;  %v65_v17 = vld [vmem:[%s701_s2 + $0x8] sm:$0xff]  ;;  %v67_v18 = vld [vmem:[%s701_s2 + $0x18] sm:$0xff] }
   0x5   :  { %414 = vmatpush3.bf16.xpose.msra.mxu0 %v126_v7  ;;  %429 = vmatprep.mubr.msk.bf16.mxu0 %vm112_vm0, %v60_v12  ;;  %v129_v15 = vsel %vm112_vm0, %v45_v6, 0 }
   0x6   :  { %458 = vmatprep.subr.msk.bf16.mxu0 %vm112_vm0, %v45_v6  ;;  %74 = vperm.xlu0 %469, %v64_v13  }
   0xd   :  { %416 = vmatpush3.bf16.xpose.msra.mxu0 %v129_v15 }
   0xe   :  { %12 = vsyncpa [#allocation3], 0  ;;  %459 = vmatprep.subr.msk.bf16.mxu0 %vm112_vm0, %v46_v16  ;;  %79 = vperm.xlu0 %469, %v65_v17   ;;  %v34_v19 = vld [vmem:[%s699_s0 + $0x30] sm:$0xff]  ;;  %v35_v20 = vld [vmem:[%s699_s0 + $0x38] sm:$0xff]  ;;  %v132_v23 = vsel %vm112_vm0, %v46_v16, 0  ;;  %vm256_vm1 = vcmask 523264  }
   0xf   :  { %v68_v21 = vld [vmem:[%s701_s2 + $0x20] sm:$0xff]  ;;  %89 = vperm.xlu1 %470, %v67_v18   ;;  %v69_v22 = vld [vmem:[%s701_s2 + $0x28] sm:$0xff]  ;;  %v47_v24 = vpack.c.bf16 %v35_v20, %v34_v19  ;;  %v70_v25 = vld [vmem:[%s701_s2 + $0x30] sm:$0xff]  ;;  %vm497_vm2 = vmmov 0   ;;  %vm326_vm3 = vcmask 261120   ;;  %s498_s8 = smov [#allocation2]  }
  0x10   :  { %v71_v26 = vld [vmem:[%s701_s2 + $0x38] sm:$0xff]  ;;  %v36_v27 = vld [vmem:[%s699_s0 + $0x40] sm:$0xff]  ;;  %v37_v28 = vld [vmem:[%s699_s0 + $0x48] sm:$0xff]  ;;  %s377_s9 = sshll.u32 %s498_s8, 4  ;;  %s378_s9 = int_to_ptr.vmem [resolvable:$true] %s377_s9 }
  0x11   :  { %v232_v29 = vld [vmem:[%s703_s4] sm:$0xff]  ;;  %v233_v30 = vld [vmem:[%s703_s4 + $0x8] sm:$0xff]  ;;  %v135_v31 = vsel %vm112_vm0, %v47_v24, 0  ;;  %v48_v32 = vpack.c.bf16 %v37_v28, %v36_v27  ;;  %v234_v33 = vld [vmem:[%s703_s4 + $0x10] sm:$0xff]  ;;  %s471_s10 = scalar_lea.vmem %s378_s9, 64  ;;  %p476_p1 = scmp.lt.s32.totalorder %s378_s9, %s378_s9 }
  0x12   :  { %94 = vperm.xlu0 %469, %v68_v21   ;;  %v235_v34 = vld [vmem:[%s703_s4 + $0x18] sm:$0xff]  ;;  %v38_v35 = vld [vmem:[%s699_s0 + $0x50] sm:$0xff]  ;;  %v320_v37 = vld [vmem:[%s705_s6] sm:$0xf]  ;;  %p472_p0 = scmp.ne.s32.totalorder %s378_s9, %s471_s10  ;;  %p477_p2 = scmp.lt.s32.totalorder %s471_s10, %s471_s10 }
  0x13   :  { %99 = vperm.xlu1 %470, %v69_v22   ;;  %v39_v36 = vld [vmem:[%s699_s0 + $0x58] sm:$0xff]  ;;  %v138_v38 = vsel %vm112_vm0, %v48_v32, 0  ;;  %v40_v40 = vld [vmem:[%s699_s0 + $0x60] sm:$0xff]  ;;  %v41_v41 = vld [vmem:[%s699_s0 + $0x68] sm:$0xff] }
  0x14   :  { %v49_v39 = vpack.c.bf16 %v39_v36, %v38_v35  ;;  %v50_v43 = vpack.c.bf16 %v41_v41, %v40_v40  ;;  %v42_v44 = vld [vmem:[%s699_s0 + $0x70] sm:$0xff]  ;;  %v43_v45 = vld [vmem:[%s699_s0 + $0x78] sm:$0xff]  ;;  %v56_v51 = vld [vmem:[%s700_s1 + $0x20] sm:$0xff]  ;;  %v496_v36 = vmov 0.0   ;;  %p478_p3 = por %p477_p2, %p476_p1 }
  0x15   :  { %418 = vmatpush3.bf16.xpose.msra.mxu0 %v132_v23  ;;  %v51_v47 = vpack.c.bf16 %v43_v45, %v42_v44  ;;  %v54_v49 = vld [vmem:[%s700_s1 + $0x10] sm:$0xff]  ;;  %v55_v50 = vld [vmem:[%s700_s1 + $0x18] sm:$0xff]  ;;  %v57_v52 = vld [vmem:[%s700_s1 + $0x28] sm:$0xff] }
  0x16   :  { %460 = vmatprep.subr.msk.bf16.mxu0 %vm112_vm0, %v47_v24  ;;  %104 = vperm.xlu0 %469, %v70_v25   ;;  %v141_v42 = vsel %vm112_vm0, %v49_v39, 0  ;;  %v144_v46 = vsel %vm112_vm0, %v50_v43, 0  ;;  %v61_v53 = vpack.c.bf16 %v55_v50, %v54_v49  ;;  %v62_v54 = vpack.c.bf16 %v57_v52, %v56_v51  ;;  %v58_v55 = vld [vmem:[%s700_s1 + $0x30] sm:$0xff]  ;;  %v59_v56 = vld [vmem:[%s700_s1 + $0x38] sm:$0xff]  ;;  %v222_v58 = vld [vmem:[%s702_s3] sm:$0xff]  ;;  %p479_p4 = pnand %p478_p3, %p472_p0 }
  0x17   :  { %109 = vperm.xlu1 %470, %v71_v26   ;;  %v147_v48 = vsel %vm112_vm0, %v51_v47, 0  ;;  %v63_v57 = vpack.c.bf16 %v59_v56, %v58_v55  ;;  %v223_v59 = vld [vmem:[%s702_s3 + $0x8] sm:$0xff]  ;;  %v316_v55 = vld [vmem:[%s704_s5] sm:$0xf] }
  0x18   :  { %v226_v60 = vpack.c.bf16 %v223_v59, %v222_v58  ;;  %v317_v56 = vpack.c.bf16 %v316_v55, %v316_v55 }
  0x1a   :  { %238 = vperm.xlu0 %469, %v232_v29   ;;  %445 = vmatprep.mubr.msk.bf16.mxu1 %vm256_vm1, %v226_v60 }
  0x1b   :  { %243 = vperm.xlu1 %470, %v233_v30  }
  0x1d   :  { %420 = vmatpush3.bf16.xpose.msra.mxu0 %v135_v31 }
  0x1e   :  { %461 = vmatprep.subr.msk.bf16.mxu0 %vm112_vm0, %v48_v32  ;;  %248 = vperm.xlu0 %469, %v234_v33   ;;  %v224_v33 = vld [vmem:[%s702_s3 + $0x10] sm:$0xff] }
  0x1f   :  { %253 = vperm.xlu1 %470, %v235_v34   ;;  %v225_v34 = vld [vmem:[%s702_s3 + $0x18] sm:$0xff] }
  0x20   :  { %v227_v35 = vpack.c.bf16 %v225_v34, %v224_v33 }
  0x22   :  { %323 = vperm.xlu0 %469, %v320_v37  }
  0x25   :  { %422 = vmatpush3.bf16.xpose.msra.mxu0 %v138_v38 }
  0x26   :  { %462 = vmatprep.subr.msk.bf16.mxu0 %vm112_vm0, %v49_v39 }
  0x2d   :  { %424 = vmatpush3.bf16.xpose.msra.mxu0 %v141_v42 }
  0x2e   :  { %463 = vmatprep.subr.msk.bf16.mxu0 %vm112_vm0, %v50_v43 }
  0x35   :  { %426 = vmatpush3.bf16.xpose.msra.mxu0 %v144_v46 }
  0x36   :  { %464 = vmatprep.subr.msk.bf16.mxu0 %vm112_vm0, %v51_v47 }
  0x3d   :  { %428 = vmatpush3.bf16.xpose.msra.mxu0 %v147_v48 }
  0x44   :  { %430 = vmatmul.mubr.msk.bf16.vlgmr.msra.gmra.mrb[0].mxu0 %vm112_vm0, %v61_v53 }
  0x45   :  { %433 = vmatprep.mubr.msk.bf16.mxu0 %vm112_vm0, %v62_v54 }
  0x4c   :  { %434 = vmatmul.mubr.msk.bf16.gmra.mrb[4].mxu0 %vm112_vm0, %v63_v57 }
  0x83   :  { %v85_v62 = vpop.permute.xlu1 %84 }
  0x85   :  { %v75_v61 = vpop.permute.xlu0 %74 }
  0x8d   :  { %v80_v63 = vpop.permute.xlu0 %79 }
  0x8e   :  { %v90_v0 = vpop.permute.xlu1 %89 }
  0x91   :  { %v95_v4 = vpop.permute.xlu0 %94 }
  0x92   :  { %v100_v9 = vpop.permute.xlu1 %99 }
  0x95   :  { %v105_v16 = vpop.permute.xlu0 %104 }
  0x96   :  { %v110_v21 = vpop.permute.xlu1 %109 }
  0x99   :  { %v239_v37 = vpop.permute.xlu0 %238 }
  0x9a   :  { %v244_v38 = vpop.permute.xlu1 %243 }
  0x9d   :  { %v249_v39 = vpop.permute.xlu0 %248 }
  0x9e   :  { %v254_v43 = vpop.permute.xlu1 %253 }
  0xa1   :  { %v324_v57 = vpop.permute.xlu0 %323 }
 0x117   :  { %v431_v1 = vpop.f32.mrb[0].mxu0 }
 0x118   :  { %v192_v2 = vadd.f32 %v431_v1, %v85_v62  ;;  %v183_v3 = vpop.f32.mrb[1].mxu0 }
 0x119   :  { %v184_v5 = vadd.f32 %v183_v3, %v75_v61  ;;  %v432_v6 = vpop.f32.mrb[2].mxu0 }
 0x11a   :  { %v195_v7 = vadd.f32 %v432_v6, %v90_v0  ;;  %v186_v8 = vpop.f32.mrb[3].mxu0  ;;  %v216_v11 = vmax.f32 %v192_v2, 0.0 }
 0x11b   :  { %v187_v10 = vadd.f32 %v186_v8, %v80_v63  ;;  %v214_v13 = vmax.f32 %v184_v5, 0.0 }
 0x11c   :  { %v217_v12 = vmax.f32 %v195_v7, 0.0 }
 0x11d   :  { %v215_v14 = vmax.f32 %v187_v10, 0.0 }
 0x11e   :  { %v229_v15 = vpack.c.bf16 %v217_v12, %v216_v11 }
 0x11f   :  { %v435_v17 = vpop.f32.mrb[4].mxu0  ;;  %v228_v18 = vpack.c.bf16 %v215_v14, %v214_v13 }
 0x120   :  { %v208_v19 = vadd.f32 %v435_v17, %v105_v16  ;;  %v199_v20 = vpop.f32.mrb[5].mxu0 }
 0x121   :  { %v200_v22 = vadd.f32 %v199_v20, %v95_v4  ;;  %v436_v23 = vpop.f32.mrb[6].mxu0  ;;  %437 = vmatprep.subr.bf16.mxu1 %v228_v18 }
 0x122   :  { %v211_v24 = vadd.f32 %v436_v23, %v110_v21  ;;  %v202_v25 = vpop.f32.mrb[7].mxu0  ;;  %438 = vmatpush3.bf16.msra.mxu1 %v228_v18  ;;  %v220_v27 = vmax.f32 %v208_v19, 0.0 }
 0x123   :  { %v203_v26 = vadd.f32 %v202_v25, %v100_v9  ;;  %439 = vmatprep.subr.bf16.mxu1 %v229_v15  ;;  %v218_v29 = vmax.f32 %v200_v22, 0.0 }
 0x124   :  { %v221_v28 = vmax.f32 %v211_v24, 0.0 }
 0x125   :  { %v219_v30 = vmax.f32 %v203_v26, 0.0 }
 0x126   :  { %v231_v31 = vpack.c.bf16 %v221_v28, %v220_v27  ;;  %440 = vmatpush3.bf16.msra.mxu1 %v229_v15 }
 0x127   :  { %v230_v32 = vpack.c.bf16 %v219_v30, %v218_v29 }
 0x129   :  { %441 = vmatprep.subr.bf16.mxu1 %v230_v32 }
 0x12a   :  { %442 = vmatpush3.bf16.msra.mxu1 %v230_v32 }
 0x12b   :  { %443 = vmatprep.subr.bf16.mxu1 %v231_v31 }
 0x12e   :  { %444 = vmatpush3.bf16.msra.mxu1 %v231_v31 }
 0x12f   :  { %449 = vmatprep.subr.bf16.mxu1 %v496_v36 }
 0x131   :  { %446 = vmatmul.mubr.msk.bf16.vlgmr.msra.gmra.mrb[0].mxu1 %vm256_vm1, %v227_v35 }
 0x132   :  { %453 = vmatprep.mubr.msk.bf16.mxu1 %vm497_vm2, %v496_v36 }
 0x204   :  { %v447_v40 = vpop.f32.mrb[0].mxu1 }
 0x205   :  { %v306_v41 = vadd.f32 %v447_v40, %v249_v39  ;;  %v297_v42 = vpop.f32.mrb[1].mxu1 }
 0x206   :  { %v298_v44 = vadd.f32 %v297_v42, %v239_v37  ;;  %v448_v45 = vpop.f32.mrb[2].mxu1 }
 0x207   :  { %v309_v46 = vadd.f32 %v448_v45, %v254_v43  ;;  %v300_v47 = vpop.f32.mrb[3].mxu1  ;;  %v314_v49 = vmax.f32 %v306_v41, 0.0 }
 0x208   :  { %v301_v48 = vadd.f32 %v300_v47, %v244_v38  ;;  %v312_v51 = vmax.f32 %v298_v44, 0.0 }
 0x209   :  { %v315_v50 = vmax.f32 %v309_v46, 0.0 }
 0x20a   :  { %v313_v52 = vmax.f32 %v301_v48, 0.0 }
 0x20b   :  { %v319_v53 = vpack.c.bf16 %v315_v50, %v314_v49 }
 0x20c   :  { %v318_v54 = vpack.c.bf16 %v313_v52, %v312_v51 }
 0x20e   :  { %450 = vmatpush3.bf16.msra.mxu1 %v318_v54 }
 0x20f   :  { %451 = vmatprep.subr.bf16.mxu1 %v496_v36 }
 0x212   :  { %452 = vmatpush3.bf16.msra.mxu1 %v319_v53 }
 0x215   :  { %454 = vmatmul.mubr.msk.bf16.vlgmr.msra.gmra.mrb[4].mxu1 %vm326_vm3, %v317_v56 }
 0x2e8   :  { %v364_v58 = vpop.f32.mrb[4].mxu1 }
 0x2e9   :  { %v365_v59 = vadd.f32 %v364_v58, %v324_v57  ;;  %v455_v60 = vpop.f32.mrb[5].mxu1 }
 0x2ea   :  { %v367_v61 = vpop.f32.mrb[6].mxu1 }
 0x2eb   :  { %370 = vst [vmem:[#allocation2] sm:$0xf] %v365_v59  ;;  %v456_v62 = vpop.f32.mrb[7].mxu1 }
 0x2ec   :  { %482 = shalt.err (!%p479_p4)
}
 0x2ed   :  { %s483_s11 = scalar_lea.hbm %s706_s7, 64 }
 0x2ee   :  { %p484_p5 = scmp.ne.s32.totalorder %s706_s7, %s483_s11  ;;  %p487_p6 = scmp.lt.u32.totalorder %s483_s11, %s706_s7 }
 0x2f0   :  { %p489_p7 = pnand %p487_p6, %p484_p5 }
 0x2f2   :  { %492 = shalt.err (!%p489_p7)
}
 0x2f3   :  { %380 = dma.vmem_to_hbm [thread:$0]  %s378_s9, 64, %s706_s7, [#allocation3]  }
 0x2f4   :  { %493 = dma.done.wait [#allocation3], 64  }
 0x2f5   :  { %494 = vsyncadd [#allocation3], 4294967232 }
 0x2f6   :  { %384 = vsyncpa [#allocation3], 1 }

</bundles_post_ra>
